<compile_context>
chip_gen: v6e
topology: v6e:2x2x1
jax: 0.10.0
libtpu: 0.0.40
codegen_flags: <defaults>
</compile_context>

<pallas_src>
import functools
import math

import jax
import jax.numpy as jnp
from jax import lax
from jax.experimental import pallas as pl
from jax.experimental.pallas import tpu as pltpu


# ----------------------------------------------------------------------------
# Pallas kernel: one lane tile of the flattened dense spatial grid.
# ----------------------------------------------------------------------------
def _coordconv_kernel(x_ref, xh_ref, w_ref, b_ref, o_ref, win_ref, *,
                      shifts, tile):
    """x_ref:   (Cin_p, T)          current lane tile (bf16)
       xh_ref:  (Cin_p, HB)         halo lanes just past the tile (bf16)
       w_ref:   (KK, Cout_p, Cin_p) per-tap weights (bf16)
       b_ref:   (Cout_p, 1)         bias (f32)
       o_ref:   (Cout_p, T)         output tile (input dtype)
       win_ref: (Cin_p, T+HB)       VMEM scratch window = tile ++ halo
    """
    # Assemble the window once (aligned stores), then each tap is a static
    # lane-shifted re-read of VMEM — no HBM duplication.
    win_ref[:, :tile] = x_ref[...]
    win_ref[:, tile:] = xh_ref[...]

    cout = o_ref.shape[0]
    acc = jnp.zeros((cout, tile), jnp.float32)
    for kk, s in enumerate(shifts):            # static unroll over KH*KW taps
        tap = win_ref[:, s:s + tile]           # (Cin_p, T), VMEM re-read
        acc = acc + jnp.dot(w_ref[kk], tap,
                            preferred_element_type=jnp.float32)
    o_ref[...] = (acc + b_ref[...]).astype(o_ref.dtype)


# ----------------------------------------------------------------------------
# Wrapper glue.
# ----------------------------------------------------------------------------
def _vmem_capacity_bytes():
    try:
        info = pltpu.get_tpu_info()
        cap = getattr(info, "vmem_capacity_bytes", None)
        if cap:
            return int(cap)
    except Exception:
        pass
    return 64 << 20   # conservative fallback (v7x per-core VMEM)


def _choose_tile(total_lanes, cin_p, cout_p, hb, in_bytes, out_bytes,
                 budget_bytes):
    """Largest lane tile (multiple of the halo block HB) whose working set
    (double-buffered in/out blocks, window scratch, tap temporaries, f32
    accumulator) fits the per-generation VMEM budget.  Also keeps >= 2 grid
    tiles when possible so both v7x TensorCores get work."""
    per_lane = cin_p * in_bytes * 6 + cout_p * out_bytes * 2 + cout_p * 4
    t_budget = max(1, budget_bytes // per_lane)
    t_half = -(-total_lanes // 2)              # >= 2 tiles when possible
    t = min(t_budget, t_half, 131072)
    t = (t // hb) * hb if t >= hb else hb
    return int(max(t, hb))


def _build_channel_major_input(x_nchw, with_r, padding, cin_pad, compute_dtype):
    """AddCoordinates (PyTorch convention) + zero padding, emitted directly in
    channel-major (Cin_p, N, Hp, Wp) so no extra HBM transpose pass is needed."""
    N, Cin, H, W = x_nchw.shape
    hd = float(max(H - 1, 1))                  # guard degenerate H==1 / W==1
    wd = float(max(W - 1, 1))
    yy = 2.0 * jnp.arange(H, dtype=jnp.float32)[:, None] / hd - 1.0
    xx = 2.0 * jnp.arange(W, dtype=jnp.float32)[None, :] / wd - 1.0
    yy = jnp.broadcast_to(yy, (H, W))
    xx = jnp.broadcast_to(xx, (H, W))
    coords = [yy, xx]
    if with_r:
        rr = jnp.sqrt(yy * yy + xx * xx)
        rr = rr / jnp.maximum(jnp.max(rr), 1e-12)   # clamp: all-zero r case
        coords.append(rr)
    coords = jnp.stack(coords, axis=0)                         # (Cc, H, W)
    coords = jnp.broadcast_to(coords[:, None], (coords.shape[0], N, H, W))
    img = jnp.transpose(x_nchw, (1, 0, 2, 3)).astype(jnp.float32)
    xa = jnp.concatenate([coords, img], axis=0)                # (Cin_aug,N,H,W)
    cin_aug = xa.shape[0]
    xa = jnp.pad(xa, ((0, cin_pad - cin_aug), (0, 0),
                      (padding, padding), (padding, padding)))
    return xa.astype(compute_dtype)                            # (Cin_p,N,Hp,Wp)


def coordconv_pallas(x_nchw, weight_oihw, bias=None, *, stride=1, padding=0,
                     dilation=1, with_r=False, compute_dtype=jnp.bfloat16):
    """CoordConv forward. x_nchw: (N, Cin, H, W) -> (N, Cout, Ho, Wo)."""
    N, Cin, H, W = x_nchw.shape
    Cout, Cin_aug, KH, KW = weight_oihw.shape
    assert Cin_aug == Cin + (3 if with_r else 2), (Cin_aug, Cin)
    # TODO(synk): groups != 1 is not supported (module default groups=1).

    out_dtype = x_nchw.dtype
    Cin_p = -(-Cin_aug // 8) * 8
    Cout_p = -(-Cout // 8) * 8

    # --- coordinate channels + spatial zero-padding (cheap glue, plain JAX) --
    xa = _build_channel_major_input(x_nchw, with_r, padding, Cin_p,
                                    compute_dtype)             # (Cin_p,N,Hp,Wp)
    Hp, Wp = xa.shape[2], xa.shape[3]
    Ho = (Hp - dilation * (KH - 1) - 1) // stride + 1
    Wo = (Wp - dilation * (KW - 1) - 1) // stride + 1
    assert Ho > 0 and Wo > 0, (Ho, Wo)

    # --- flattened dense spatial lane axis, batch folded in -----------------
    L = N * Hp * Wp
    x_flat = xa.reshape(Cin_p, L)

    # Tap shifts along the flattened lane axis (static python ints).
    shifts = [kh * dilation * Wp + kw * dilation
              for kh in range(KH) for kw in range(KW)]
    HB = max(128, -(-max(shifts) // 128) * 128)    # halo block (lane-aligned)

    in_b = jnp.dtype(compute_dtype).itemsize
    out_b = jnp.dtype(out_dtype).itemsize
    vmem_cap = _vmem_capacity_bytes()
    vmem_limit = int(max(32 << 20, min(vmem_cap * 3 // 4, 112 << 20)))
    T = _choose_tile(L, Cin_p, Cout_p, HB, in_b, out_b, vmem_limit // 2)

    n_tiles = -(-L // T)
    Lpad = n_tiles * T + HB                        # trailing halo stays in-bounds
    x_flat = jnp.pad(x_flat, ((0, 0), (0, Lpad - L)))

    # --- per-tap weights / bias ---------------------------------------------
    KK = KH * KW
    w_taps = jnp.transpose(weight_oihw, (2, 3, 0, 1)).reshape(KK, Cout, Cin_aug)
    w_taps = jnp.pad(w_taps, ((0, 0), (0, Cout_p - Cout),
                              (0, Cin_p - Cin_aug))).astype(compute_dtype)
    if bias is None:
        bias = jnp.zeros((Cout,), jnp.float32)
    b2d = jnp.pad(bias.astype(jnp.float32), (0, Cout_p - Cout)).reshape(Cout_p, 1)

    flops = 2 * Cout * Cin_aug * KK * N * Ho * Wo
    bytes_accessed = (Cin_p * Lpad * in_b                      # main input read
                      + Cin_p * HB * in_b * n_tiles            # halo re-reads
                      + KK * Cout_p * Cin_p * in_b             # weights
                      + Cout_p * n_tiles * T * out_b)          # output write

    kernel = functools.partial(_coordconv_kernel, shifts=shifts, tile=T)
    halo_step = T // HB                                        # T % HB == 0

    y = pl.pallas_call(
        kernel,
        out_shape=jax.ShapeDtypeStruct((Cout_p, n_tiles * T), out_dtype),
        grid_spec=pltpu.PrefetchScalarGridSpec(
            num_scalar_prefetch=0,
            grid=(n_tiles,),
            in_specs=[
                pl.BlockSpec((Cin_p, T), lambda t: (0, t)),
                pl.BlockSpec((Cin_p, HB), lambda t: (0, (t + 1) * halo_step)),
                pl.BlockSpec((KK, Cout_p, Cin_p), lambda t: (0, 0, 0)),
                pl.BlockSpec((Cout_p, 1), lambda t: (0, 0)),
            ],
            out_specs=pl.BlockSpec((Cout_p, T), lambda t: (0, t)),
            scratch_shapes=[pltpu.VMEM((Cin_p, T + HB), compute_dtype)],
        ),
        compiler_params=pltpu.CompilerParams(
            dimension_semantics=("parallel",),
            vmem_limit_bytes=vmem_limit),
        cost_estimate=pl.CostEstimate(
            flops=flops, transcendentals=0, bytes_accessed=bytes_accessed),
    )(x_flat, x_flat, w_taps, b2d)

    # --- drop padding / row-wrap garbage columns, restore NCHW --------------
    y = y[:Cout, :L].reshape(Cout, N, Hp, Wp)
    y = y[:, :, 0:(Ho - 1) * stride + 1:stride, 0:(Wo - 1) * stride + 1:stride]
    return jnp.transpose(y, (1, 0, 2, 3))                      # (N, Cout, Ho, Wo)


# ----------------------------------------------------------------------------
# Reference (pure JAX, f32, HIGHEST precision) for verification.
# NOTE: coordinate convention (y first, x second, [-1,1], r/max(r)) matches the
# PyTorch AddCoordinates implementation in the spec.
# ----------------------------------------------------------------------------
def coordconv_ref(x_nchw, weight_oihw, bias, *, stride=1, padding=0,
                  dilation=1, with_r=False):
    N, Cin, H, W = x_nchw.shape
    hd = float(max(H - 1, 1))
    wd = float(max(W - 1, 1))
    yy = 2.0 * jnp.arange(H, dtype=jnp.float32)[:, None] / hd - 1.0
    xx = 2.0 * jnp.arange(W, dtype=jnp.float32)[None, :] / wd - 1.0
    yy = jnp.broadcast_to(yy, (H, W))
    xx = jnp.broadcast_to(xx, (H, W))
    coords = [yy, xx]
    if with_r:
        rr = jnp.sqrt(yy * yy + xx * xx)
        rr = rr / jnp.maximum(jnp.max(rr), 1e-12)
        coords.append(rr)
    coords = jnp.stack(coords, axis=0)
    coords = jnp.broadcast_to(coords[None], (N,) + coords.shape)
    xa = jnp.concatenate([coords, x_nchw.astype(jnp.float32)], axis=1)
    out = lax.conv_general_dilated(
        xa, weight_oihw.astype(jnp.float32),
        window_strides=(stride, stride),
        padding=[(padding, padding), (padding, padding)],
        rhs_dilation=(dilation, dilation),
        dimension_numbers=("NCHW", "OIHW", "NCHW"),
        precision=lax.Precision.HIGHEST)
    if bias is not None:
        out = out + bias.astype(jnp.float32)[None, :, None, None]
    return out


if __name__ == "__main__":
    # CoordConv(in_channels=4, out_channels=8, kernel_size=3, padding=1, with_r=True)
    N, Cin, H, W = 2, 4, 16, 16
    Cout, K = 8, 3
    with_r = True
    padding = 1
    Cin_aug = Cin + (3 if with_r else 2)

    key = jax.random.PRNGKey(0)
    kx, kw, kb = jax.random.split(key, 3)

    x = jax.random.normal(kx, (N, Cin, H, W), dtype=jnp.float32)

    # Deterministic Conv2d-style init (uniform in +/- 1/sqrt(fan_in)).
    fan_in = Cin_aug * K * K
    bound = 1.0 / math.sqrt(fan_in)
    weight = jax.random.uniform(kw, (Cout, Cin_aug, K, K), jnp.float32,
                                -bound, bound)
    bias = jax.random.uniform(kb, (Cout,), jnp.float32, -bound, bound)

    out = coordconv_pallas(x, weight, bias, stride=1, padding=padding,
                           dilation=1, with_r=with_r)
    out = jax.block_until_ready(out)
    assert out.shape == (N, Cout, H, W), out.shape

    ref = coordconv_ref(x, weight, bias, stride=1, padding=padding,
                        dilation=1, with_r=with_r)
    err = float(jnp.max(jnp.abs(out - ref)))
    # bf16 input/weight stream with f32 accumulation: loosened tolerance.
    assert err < 3e-2, err

    print("KERNEL_OK")
</pallas_src>

<mosaic_0001>
module attributes {stable_mosaic.version = 11 : i64} {
  func.func @_coordconv_kernel(%arg0: i32, %arg1: memref<8x256xbf16, #tpu.memory_space<vmem>>, %arg2: memref<8x128xbf16, #tpu.memory_space<vmem>>, %arg3: memref<9x8x8xbf16, #tpu.memory_space<vmem>>, %arg4: memref<8x1xf32, #tpu.memory_space<vmem>>, %arg5: memref<8x256xf32, #tpu.memory_space<vmem>>, %arg6: memref<8x384xbf16, #tpu.memory_space<vmem>>) attributes {dimension_semantics = [#tpu.dimension_semantics<parallel>], iteration_bounds = array<i64: 3>, scalar_prefetch = 0 : i64, scratch_operands = 1 : i64, tpu.core_type = #tpu.core_type<tc>, window_params = [{transform_indices = @transform_0, window_bounds = array<i64: 8, 256>}, {transform_indices = @transform_1, window_bounds = array<i64: 8, 128>}, {pipeline_mode = #tpu.pipeline_mode<synchronous>, transform_indices = @transform_2, window_bounds = array<i64: 9, 8, 8>}, {pipeline_mode = #tpu.pipeline_mode<synchronous>, transform_indices = @transform_3, window_bounds = array<i64: 8, 1>}, {transform_indices = @transform_4, window_bounds = array<i64: 8, 256>}]} {
    %c0 = arith.constant 0 : index
    %c0_0 = arith.constant 0 : index
    %0 = vector.load %arg1[%c0, %c0_0] : memref<8x256xbf16, #tpu.memory_space<vmem>>, vector<8x256xbf16>
    %c0_1 = arith.constant 0 : index
    %c0_2 = arith.constant 0 : index
    %1 = vector.load %arg6[%c0_1, %c0_2] : memref<8x384xbf16, #tpu.memory_space<vmem>>, vector<8x256xbf16>
    tpu.vector_store %arg6[%c0_1, %c0_2], %0 {strides = array<i32>} : memref<8x384xbf16, #tpu.memory_space<vmem>>, vector<8x256xbf16>,
    %c0_3 = arith.constant 0 : index
    %c0_4 = arith.constant 0 : index
    %2 = vector.load %arg2[%c0_3, %c0_4] : memref<8x128xbf16, #tpu.memory_space<vmem>>, vector<8x128xbf16>
    %c0_5 = arith.constant 0 : index
    %c256 = arith.constant 256 : index
    %3 = vector.load %arg6[%c0_5, %c256] : memref<8x384xbf16, #tpu.memory_space<vmem>>, vector<8x128xbf16>
    tpu.vector_store %arg6[%c0_5, %c256], %2 {strides = array<i32>} : memref<8x384xbf16, #tpu.memory_space<vmem>>, vector<8x128xbf16>,
    %cst = arith.constant 0.000000e+00 : f32
    %4 = vector.broadcast %cst : f32 to vector<8x256xf32>
    %c0_6 = arith.constant 0 : index
    %c0_7 = arith.constant 0 : index
    %5 = vector.load %arg6[%c0_6, %c0_7] : memref<8x384xbf16, #tpu.memory_space<vmem>>, vector<8x256xbf16>
    %c0_8 = arith.constant 0 : index
    %c0_9 = arith.constant 0 : index
    %c0_10 = arith.constant 0 : index
    %6 = vector.load %arg3[%c0_8, %c0_9, %c0_10] : memref<9x8x8xbf16, #tpu.memory_space<vmem>>, vector<1x8x8xbf16>
    %7 = vector.shape_cast %6 : vector<1x8x8xbf16> to vector<8x8xbf16>
    %cst_11 = arith.constant dense<0.000000e+00> : vector<8x256xf32>
    %8 = tpu.matmul %7, %5, %cst_11 {dimension_numbers = #tpu.dot_dimension_numbers<[1], [0], [0], [1], [0, 0, 1, 1], [], []>} : vector<8x8xbf16>, vector<8x256xbf16>, vector<8x256xf32> -> vector<8x256xf32>
    %9 = arith.addf %4, %8 : vector<8x256xf32>
    %c0_12 = arith.constant 0 : index
    %c1 = arith.constant 1 : index
    %10 = vector.load %arg6[%c0_12, %c1] : memref<8x384xbf16, #tpu.memory_space<vmem>>, vector<8x256xbf16>
    %c1_13 = arith.constant 1 : index
    %c0_14 = arith.constant 0 : index
    %c0_15 = arith.constant 0 : index
    %11 = vector.load %arg3[%c1_13, %c0_14, %c0_15] : memref<9x8x8xbf16, #tpu.memory_space<vmem>>, vector<1x8x8xbf16>
    %12 = vector.shape_cast %11 : vector<1x8x8xbf16> to vector<8x8xbf16>
    %cst_16 = arith.constant dense<0.000000e+00> : vector<8x256xf32>
    %13 = tpu.matmul %12, %10, %cst_16 {dimension_numbers = #tpu.dot_dimension_numbers<[1], [0], [0], [1], [0, 0, 1, 1], [], []>} : vector<8x8xbf16>, vector<8x256xbf16>, vector<8x256xf32> -> vector<8x256xf32>
    %14 = arith.addf %9, %13 : vector<8x256xf32>
    %c0_17 = arith.constant 0 : index
    %c2 = arith.constant 2 : index
    %15 = vector.load %arg6[%c0_17, %c2] : memref<8x384xbf16, #tpu.memory_space<vmem>>, vector<8x256xbf16>
    %c2_18 = arith.constant 2 : index
    %c0_19 = arith.constant 0 : index
    %c0_20 = arith.constant 0 : index
    %16 = vector.load %arg3[%c2_18, %c0_19, %c0_20] : memref<9x8x8xbf16, #tpu.memory_space<vmem>>, vector<1x8x8xbf16>
    %17 = vector.shape_cast %16 : vector<1x8x8xbf16> to vector<8x8xbf16>
    %cst_21 = arith.constant dense<0.000000e+00> : vector<8x256xf32>
    %18 = tpu.matmul %17, %15, %cst_21 {dimension_numbers = #tpu.dot_dimension_numbers<[1], [0], [0], [1], [0, 0, 1, 1], [], []>} : vector<8x8xbf16>, vector<8x256xbf16>, vector<8x256xf32> -> vector<8x256xf32>
    %19 = arith.addf %14, %18 : vector<8x256xf32>
    %c0_22 = arith.constant 0 : index
    %c18 = arith.constant 18 : index
    %20 = vector.load %arg6[%c0_22, %c18] : memref<8x384xbf16, #tpu.memory_space<vmem>>, vector<8x256xbf16>
    %c3 = arith.constant 3 : index
    %c0_23 = arith.constant 0 : index
    %c0_24 = arith.constant 0 : index
    %21 = vector.load %arg3[%c3, %c0_23, %c0_24] : memref<9x8x8xbf16, #tpu.memory_space<vmem>>, vector<1x8x8xbf16>
    %22 = vector.shape_cast %21 : vector<1x8x8xbf16> to vector<8x8xbf16>
    %cst_25 = arith.constant dense<0.000000e+00> : vector<8x256xf32>
    %23 = tpu.matmul %22, %20, %cst_25 {dimension_numbers = #tpu.dot_dimension_numbers<[1], [0], [0], [1], [0, 0, 1, 1], [], []>} : vector<8x8xbf16>, vector<8x256xbf16>, vector<8x256xf32> -> vector<8x256xf32>
    %24 = arith.addf %19, %23 : vector<8x256xf32>
    %c0_26 = arith.constant 0 : index
    %c19 = arith.constant 19 : index
    %25 = vector.load %arg6[%c0_26, %c19] : memref<8x384xbf16, #tpu.memory_space<vmem>>, vector<8x256xbf16>
    %c4 = arith.constant 4 : index
    %c0_27 = arith.constant 0 : index
    %c0_28 = arith.constant 0 : index
    %26 = vector.load %arg3[%c4, %c0_27, %c0_28] : memref<9x8x8xbf16, #tpu.memory_space<vmem>>, vector<1x8x8xbf16>
    %27 = vector.shape_cast %26 : vector<1x8x8xbf16> to vector<8x8xbf16>
    %cst_29 = arith.constant dense<0.000000e+00> : vector<8x256xf32>
    %28 = tpu.matmul %27, %25, %cst_29 {dimension_numbers = #tpu.dot_dimension_numbers<[1], [0], [0], [1], [0, 0, 1, 1], [], []>} : vector<8x8xbf16>, vector<8x256xbf16>, vector<8x256xf32> -> vector<8x256xf32>
    %29 = arith.addf %24, %28 : vector<8x256xf32>
    %c0_30 = arith.constant 0 : index
    %c20 = arith.constant 20 : index
    %30 = vector.load %arg6[%c0_30, %c20] : memref<8x384xbf16, #tpu.memory_space<vmem>>, vector<8x256xbf16>
    %c5 = arith.constant 5 : index
    %c0_31 = arith.constant 0 : index
    %c0_32 = arith.constant 0 : index
    %31 = vector.load %arg3[%c5, %c0_31, %c0_32] : memref<9x8x8xbf16, #tpu.memory_space<vmem>>, vector<1x8x8xbf16>
    %32 = vector.shape_cast %31 : vector<1x8x8xbf16> to vector<8x8xbf16>
    %cst_33 = arith.constant dense<0.000000e+00> : vector<8x256xf32>
    %33 = tpu.matmul %32, %30, %cst_33 {dimension_numbers = #tpu.dot_dimension_numbers<[1], [0], [0], [1], [0, 0, 1, 1], [], []>} : vector<8x8xbf16>, vector<8x256xbf16>, vector<8x256xf32> -> vector<8x256xf32>
    %34 = arith.addf %29, %33 : vector<8x256xf32>
    %c0_34 = arith.constant 0 : index
    %c36 = arith.constant 36 : index
    %35 = vector.load %arg6[%c0_34, %c36] : memref<8x384xbf16, #tpu.memory_space<vmem>>, vector<8x256xbf16>
    %c6 = arith.constant 6 : index
    %c0_35 = arith.constant 0 : index
    %c0_36 = arith.constant 0 : index
    %36 = vector.load %arg3[%c6, %c0_35, %c0_36] : memref<9x8x8xbf16, #tpu.memory_space<vmem>>, vector<1x8x8xbf16>
    %37 = vector.shape_cast %36 : vector<1x8x8xbf16> to vector<8x8xbf16>
    %cst_37 = arith.constant dense<0.000000e+00> : vector<8x256xf32>
    %38 = tpu.matmul %37, %35, %cst_37 {dimension_numbers = #tpu.dot_dimension_numbers<[1], [0], [0], [1], [0, 0, 1, 1], [], []>} : vector<8x8xbf16>, vector<8x256xbf16>, vector<8x256xf32> -> vector<8x256xf32>
    %39 = arith.addf %34, %38 : vector<8x256xf32>
    %c0_38 = arith.constant 0 : index
    %c37 = arith.constant 37 : index
    %40 = vector.load %arg6[%c0_38, %c37] : memref<8x384xbf16, #tpu.memory_space<vmem>>, vector<8x256xbf16>
    %c7 = arith.constant 7 : index
    %c0_39 = arith.constant 0 : index
    %c0_40 = arith.constant 0 : index
    %41 = vector.load %arg3[%c7, %c0_39, %c0_40] : memref<9x8x8xbf16, #tpu.memory_space<vmem>>, vector<1x8x8xbf16>
    %42 = vector.shape_cast %41 : vector<1x8x8xbf16> to vector<8x8xbf16>
    %cst_41 = arith.constant dense<0.000000e+00> : vector<8x256xf32>
    %43 = tpu.matmul %42, %40, %cst_41 {dimension_numbers = #tpu.dot_dimension_numbers<[1], [0], [0], [1], [0, 0, 1, 1], [], []>} : vector<8x8xbf16>, vector<8x256xbf16>, vector<8x256xf32> -> vector<8x256xf32>
    %44 = arith.addf %39, %43 : vector<8x256xf32>
    %c0_42 = arith.constant 0 : index
    %c38 = arith.constant 38 : index
    %45 = vector.load %arg6[%c0_42, %c38] : memref<8x384xbf16, #tpu.memory_space<vmem>>, vector<8x256xbf16>
    %c8 = arith.constant 8 : index
    %c0_43 = arith.constant 0 : index
    %c0_44 = arith.constant 0 : index
    %46 = vector.load %arg3[%c8, %c0_43, %c0_44] : memref<9x8x8xbf16, #tpu.memory_space<vmem>>, vector<1x8x8xbf16>
    %47 = vector.shape_cast %46 : vector<1x8x8xbf16> to vector<8x8xbf16>
    %cst_45 = arith.constant dense<0.000000e+00> : vector<8x256xf32>
    %48 = tpu.matmul %47, %45, %cst_45 {dimension_numbers = #tpu.dot_dimension_numbers<[1], [0], [0], [1], [0, 0, 1, 1], [], []>} : vector<8x8xbf16>, vector<8x256xbf16>, vector<8x256xf32> -> vector<8x256xf32>
    %49 = arith.addf %44, %48 : vector<8x256xf32>
    %c0_46 = arith.constant 0 : index
    %c0_47 = arith.constant 0 : index
    %50 = vector.load %arg4[%c0_46, %c0_47] : memref<8x1xf32, #tpu.memory_space<vmem>>, vector<8x1xf32>
    %51 = vector.broadcast %50 : vector<8x1xf32> to vector<8x256xf32>
    %52 = arith.addf %49, %51 : vector<8x256xf32>
    %c0_48 = arith.constant 0 : index
    %c0_49 = arith.constant 0 : index
    %53 = vector.load %arg5[%c0_48, %c0_49] : memref<8x256xf32, #tpu.memory_space<vmem>>, vector<8x256xf32>
    tpu.vector_store %arg5[%c0_48, %c0_49], %52 {strides = array<i32>} : memref<8x256xf32, #tpu.memory_space<vmem>>, vector<8x256xf32>,
    return
  }
  func.func @transform_0(%arg0: i32) -> (i32, i32) {
    %c0_i32 = arith.constant 0 : i32
    %c0_i32_0 = arith.constant 0 : i32
    return %c0_i32, %arg0 : i32, i32
  }
  func.func @transform_1(%arg0: i32) -> (i32, i32) {
    %c1_i32 = arith.constant 1 : i32
    %0 = arith.addi %arg0, %c1_i32 : i32
    %c2_i32 = arith.constant 2 : i32
    %1 = arith.muli %0, %c2_i32 : i32
    %c0_i32 = arith.constant 0 : i32
    %c0_i32_0 = arith.constant 0 : i32
    return %c0_i32, %1 : i32, i32
  }
  func.func @transform_2(%arg0: i32) -> (i32, i32, i32) {
    %c0_i32 = arith.constant 0 : i32
    %c0_i32_0 = arith.constant 0 : i32
    %c0_i32_1 = arith.constant 0 : i32
    %c0_i32_2 = arith.constant 0 : i32
    return %c0_i32, %c0_i32_0, %c0_i32_1 : i32, i32, i32
  }
  func.func @transform_3(%arg0: i32) -> (i32, i32) {
    %c0_i32 = arith.constant 0 : i32
    %c0_i32_0 = arith.constant 0 : i32
    %c0_i32_1 = arith.constant 0 : i32
    return %c0_i32, %c0_i32_0 : i32, i32
  }
  func.func @transform_4(%arg0: i32) -> (i32, i32) {
    %c0_i32 = arith.constant 0 : i32
    %c0_i32_0 = arith.constant 0 : i32
    return %c0_i32, %arg0 : i32, i32
  }
}

</mosaic_0001>

<bundles_post_ra>
// kernel: tpu_custom_call.1
= control target key start
LH: loop header
LB: loop body
LE: loop exit
PB: predicated region body
PF: predicated region fallthrough
CT: control target
= control target key end

     0   :  { %9 = vsyncpa [#allocation4], 0  ;;  %s1291_s0 = inlined_call_operand.vmem [shape: bf16[8,896], index: 0, kind: input, shape index: {}]   ;;  %s1292_s1 = inlined_call_operand.vmem [shape: bf16[8,896], index: 1, kind: input, shape index: {}]   ;;  %s1293_s2 = inlined_call_operand.vmem [shape: bf16[9,8,8], index: 2, kind: input, shape index: {}]   ;;  %s1294_s3 = inlined_call_operand.vmem [shape: f32[8,1], index: 3, kind: input, shape index: {}]   ;;  %s1295_s4 = inlined_call_operand.hbm [shape: f32[8,768], index: 4, kind: output, shape index: {}]  }
   0x1   :  { %11 = vsyncpa [#allocation4 + $0x1], 0  ;;  %s1125_s15 = smov 0   ;;  %s1127_s16 = smov 0  }
   0x2   :  { %s1129_s17 = smov 0   ;;  %s1131_s18 = smov 0  }
   0x3 LB: > { %s1146_s19 = sadd.s32 4294967295, %s1088_s18   ;;  %s922_s20 = sadd.s32 4294967294, %s1088_s18   ;;  %s1088_s18 = sphi %s1131_s18, %s1301_s18   ;;  %s1084_s17 = sphi %s1129_s17, %s1300_s17   ;;  %s1080_s16 = sphi %s1127_s16, %s1299_s16   ;;  %s1076_s15 = sphi %s1125_s15, %s1298_s15  }
   0x4   : > { %s1150_s21 = sadd.s32 1, %s1088_s18   ;;  %s122_s22 = sadd.s32 1, %s1084_s17 }
   0x5   : > { %s119_s23 = ssub.s32 %s1088_s18, %s1150_s21  ;;  %p132_p0 = scmp.ne.s32.totalorder %s1084_s17, %s1080_s16 }
   0x6   : > { %p120_p1 = scmp.eq.s32.totalorder %s119_s23, 0  ;;  %p133_p2 = scmp.eq.s32.totalorder %s1146_s19, 2 }
   0x7   : > { %p138_p3 = scmp.ne.s32.totalorder %s1080_s16, %s1076_s15  ;;  %p139_p4 = scmp.eq.s32.totalorder %s922_s20, 2 }
   0x8   : > { %s1161_s24 = scalar_select %p120_p1, %s1084_s17, %s122_s22  }
   0x9   : > { %p1163_p5 = por %p133_p2, %p132_p0  ;;  %p1167_p6 = por %p139_p4, %p138_p3 }
   0xa   : > { %p927_p7 = scmp.ge.s32.totalorder %s1088_s18, 1  ;;  %p191_p8 = scmp.lt.s32.totalorder %s1088_s18, 4 }
   0xc   : > { %p192_p9 = pnand %p927_p7, %p191_p8 }
   0xd   : > { %s929_s27 = sshll.u32 (!%p192_p9), %s1146_s19, 1  ;;  %s1090_s9 = smov (!%p192_p9), 126  }
   0xe   : > { %195 = sbr.rel (%p192_p9) target bundleno = 402 (0x192), region = 36  ;;  %p232_p10 = scmp.lt.s32.totalorder (!%p192_p9), %s929_s27, 6 }
   0xf   : > { %s974_s29 = sadd.s32 (!%p192_p9), 2, %s929_s27  ;;  %s1091_s10 = smov (!%p192_p9), 127  }
  0x10   : > { %p243_p11 = scmp.lt.s32.totalorder (!%p192_p9), %s974_s29, 6  ;;  %s1093_s14 = smov (!%p192_p9), 110  }
  0x11   : > { %s1094_s23 = smov (!%p192_p9), 109   ;;  %s224_s6 = sand.u32 (!%p192_p9), 1, %s1080_s16  }
  0x13   : > { %s233_s28 = scalar_select %p232_p10, %s929_s27, 6  ;;  %vm282_vm0 = vcmask 1043456   ;;  %v1092_v5 = vmov 0   ;;  %vm278_vm1 = vcmask 64512   ;;  %v256_v6 = vld [vmem:[%s1293_s2] sm:$0xf] }
  0x14   : > { %s1303_s29 = smov (!%p243_p11, %s974_s29), 6  ;;  %321 = vmatprep.mubr.bf16.mxu0 %v1092_v5  ;;  %376 = vmatprep.mubr.bf16.mxu1 %v1092_v5  ;;  %s1095_s27 = smov 108   ;;  %v826_v8 = vld [vmem:[%s1294_s3] sm:$0xff]  ;;  %vm275_vm2 = vcmask 1039360   ;;  %vm393_vm3 = vcmask 1031168   ;;  %vm456_vm4 = vcmask 900096  }
  0x15   : > { %s930_s30 = sshll.u32 %s233_s28, 2  ;;  %s932_s8 = sshll.u32 %s1303_s29, 2  ;;  %1024 = vset.pattern.permute.xlu0 %v1092_v5  ;;  %v933_v21 = vld [vmem:[%s1293_s2 + $0x4] sm:$0xf]  ;;  %vm519_vm5 = vcmask 891904   ;;  %vm582_vm6 = vcmask 883712  }
  0x16   : > { %s235_s7 = scalar_lea.vmem %s1291_s0, %s930_s30  ;;  %s246_s13 = scalar_lea.vmem %s1292_s1, %s932_s8  ;;  %v946_v31 = vld [vmem:[%s1293_s2 + $0xc] sm:$0xf]  ;;  %v943_v34 = vld [vmem:[%s1293_s2 + $0x8] sm:$0xf]  ;;  %vm645_vm7 = vcmask 752640   ;;  %vm708_vm8 = vcmask 744448  }
  0x17   : > { %v251_v0 = vld [vmem:[%s235_s7] sm:$0xff]  ;;  %s1096_s28 = smov 92   ;;  %s1097_s29 = smov 91   ;;  %v949_v43 = vld [vmem:[%s1293_s2 + $0x10] sm:$0xf]  ;;  %vm771_vm9 = vcmask 736256  }
  0x18   : > { %v934_v1 = vcombine.low %v251_v0, %v251_v0  ;;  %v935_v2 = vcombine.high %v251_v0, %v251_v0  ;;  %v253_v4 = vld [vmem:[%s246_s13] sm:$0xf]  ;;  %s1098_s30 = smov 90   ;;  %v952_v46 = vld [vmem:[%s1293_s2 + $0x14] sm:$0xf]  ;;  %s928_s7 = sshll.u32 %s224_s6, 4 }
  0x19   : > { %254 = vst [vmem:[#allocation2 + $0x8] sm:$0xf] %v253_v4  ;;  %v955_v53 = vld [vmem:[%s1293_s2 + $0x18] sm:$0xf]  ;;  %v958_v58 = vld [vmem:[%s1293_s2 + $0x1c] sm:$0xf] }
  0x1a   : > { %387 = vrot.lane.b32.xlu1 %v934_v1, %s1090_s9  ;;  %269 = vrot.lane.b32.xlu0 %v934_v1, %s1091_s10  ;;  %v339_v3 = vsel %vm282_vm0, %v934_v1, 0  ;;  %v961_v0 = vld [vmem:[%s1293_s2 + $0x20] sm:$0xf]  ;;  %s975_s8 = sshll.u32 %s1146_s19, 8  ;;  %s1099_s19 = smov [#allocation3]  }
  0x1b   : > { %941 = vmatprep.subr.msk.bf16.mxu1 %vm282_vm0, %v935_v2  ;;  %s1254_s13 = scalar_lea.hbm %s1295_s4, %s975_s8  ;;  %s1032_s22 = sshll.u32 %s1099_s19, 4  ;;  %s1033_s22 = int_to_ptr.vmem [resolvable:$false] %s1032_s22 }
  0x1c   : > { %359 = vmatpush1.bf16.msra.mxu1 %v339_v3 }
  0x1e   : > { %452 = vrot.lane.b32.xlu1 %v935_v2, %s1093_s14  ;;  %271 = vrot.lane.b32.xlu0 %v935_v2, %s1091_s10 }
  0x1f   : > { %942 = vmatmul.mubr.msk.bf16.vlgmr.msra.gmra.mxu1 %vm278_vm1, %v256_v6 }
  0x20   : > { %500 = vmatprep.mubr.bf16.mxu1 %v1092_v5  ;;  %v1027_v7 = vld [vmem:[#allocation2 + $0x8] ss:$0 sps:$4 sm:$0xff]  }
  0x22   : > { %513 = vrot.lane.b32.xlu1 %v934_v1, %s1094_s23  ;;  %389 = vrot.lane.b32.xlu0 %v935_v2, %s1090_s9 }
  0x26   : > { %273 = vrot.lane.b32.xlu1 %v1027_v7, %s1091_s10  ;;  %450 = vrot.lane.b32.xlu0 %v934_v1, %s1093_s14 }
  0x2a   : > { %391 = vrot.lane.b32.xlu1 %v1027_v7, %s1090_s9  ;;  %454 = vrot.lane.b32.xlu0 %v1027_v7, %s1093_s14  ;;  %s226_s9 = scalar_lea.vmem [#allocation3], %s928_s7  ;;  %s837_s14 = scalar_lea.sflag [#allocation4], %s224_s6 }
  0x2b   : > { %s851_s10 = sshll.u32 %s226_s9, 4  ;;  %s852_s10 = int_to_ptr.vmem [resolvable:$true] %s851_s10 }
  0x2c   : > { %s1028_s20 = scalar_lea.vmem %s852_s10, 256  ;;  %p1035_p1 = scmp.lt.s32.totalorder %s852_s10, %s1033_s22 }
  0x2d   : > { %p1029_p12 = scmp.ne.s32.totalorder %s852_s10, %s1028_s20 }
  0x2e   : > { %517 = vrot.lane.b32.xlu1 %v1027_v7, %s1094_s23  ;;  %515 = vrot.lane.b32.xlu0 %v935_v2, %s1094_s23  ;;  %s1034_s23 = scalar_lea.vmem %s1033_s22, 512 }
  0x2f   : > { %p1030_p13 = pnand %p1029_p12, %p1163_p5  ;;  %p1036_p2 = scmp.lt.s32.totalorder %s1034_s23, %s1028_s20 }
  0x31   : > { %p1031_p0 = pneg %p1030_p13  ;;  %p1037_p3 = por %p1036_p2, %p1035_p1 }
  0x32   : > { %578 = vrot.lane.b32.xlu1 %v935_v2, %s1095_s27  ;;  %576 = vrot.lane.b32.xlu0 %v934_v1, %s1095_s27 }
  0x33   : > { %p1038_p4 = pnand %p1037_p3, %p1031_p0 }
  0x36   : > { %639 = vrot.lane.b32.xlu1 %v934_v1, %s1096_s28  ;;  %580 = vrot.lane.b32.xlu0 %v1027_v7, %s1095_s27 }
  0x3a   : > { %643 = vrot.lane.b32.xlu1 %v1027_v7, %s1096_s28  ;;  %641 = vrot.lane.b32.xlu0 %v935_v2, %s1096_s28 }
  0x3e   : > { %704 = vrot.lane.b32.xlu1 %v935_v2, %s1097_s29  ;;  %702 = vrot.lane.b32.xlu0 %v934_v1, %s1097_s29 }
  0x42   : > { %765 = vrot.lane.b32.xlu1 %v934_v1, %s1098_s30  ;;  %706 = vrot.lane.b32.xlu0 %v1027_v7, %s1097_s29 }
  0x46   : > { %769 = vrot.lane.b32.xlu1 %v1027_v7, %s1098_s30  ;;  %767 = vrot.lane.b32.xlu0 %v935_v2, %s1098_s30 }
  0x4a   : > { %829 = vperm.xlu0 %1024, %v826_v8  }
  0x8c   : > { %v388_v9 = vpop.permute.xlu1 %387  ;;  %v270_v10 = vpop.permute.xlu0 %269 }
  0x90   : > { %v453_v11 = vpop.permute.xlu1 %452  ;;  %v272_v12 = vpop.permute.xlu0 %271 }
  0x91   : > { %v276_v15 = vsel %vm275_vm2, %v270_v10, %v272_v12 }
  0x92   : > { %v284_v19 = vsel %vm282_vm0, %v276_v15, 0 }
  0x94   : > { %v514_v13 = vpop.permute.xlu1 %513  ;;  %v390_v14 = vpop.permute.xlu0 %389 }
  0x95   : > { %v394_v20 = vsel %vm393_vm3, %v388_v9, %v390_v14 }
  0x96   : > { %v400_v27 = vsel %vm282_vm0, %v394_v20, 0 }
  0x98   : > { %v274_v16 = vpop.permute.xlu1 %273  ;;  %v451_v17 = vpop.permute.xlu0 %450 }
  0x99   : > { %v277_v18 = vsel %vm275_vm2, %v272_v12, %v274_v16  ;;  %v457_v22 = vsel %vm456_vm4, %v451_v17, %v453_v11 }
  0x9a   : > { %937 = vmatprep.subr.msk.bf16.mxu0 %vm282_vm0, %v277_v18  ;;  %v463_v28 = vsel %vm282_vm0, %v457_v22, 0 }
  0x9b   : > { %304 = vmatpush1.bf16.msra.mxu0 %v284_v19 }
  0x9c   : > { %v392_v23 = vpop.permute.xlu1 %391  ;;  %v455_v24 = vpop.permute.xlu0 %454 }
  0x9d   : > { %v395_v25 = vsel %vm393_vm3, %v390_v14, %v392_v23  ;;  %v458_v26 = vsel %vm456_vm4, %v453_v11, %v455_v24 }
  0x9e   : > { %938 = vmatmul.mubr.msk.bf16.vlgmr.msra.gmra.mxu0 %vm278_vm1, %v933_v21  ;;  %944 = vmatprep.subr.msk.bf16.mxu0 %vm282_vm0, %v395_v25 }
  0x9f   : > { %947 = vmatprep.subr.msk.bf16.mxu1 %vm282_vm0, %v458_v26  ;;  %420 = vmatpush1.bf16.msra.mxu0 %v400_v27 }
  0xa0   : > { %483 = vmatpush1.bf16.msra.mxu1 %v463_v28  ;;  %v518_v29 = vpop.permute.xlu1 %517  ;;  %v516_v30 = vpop.permute.xlu0 %515  ;;  %437 = vmatprep.mubr.bf16.mxu0 %v1092_v5 }
  0xa1   : > { %v521_v32 = vsel %vm519_vm5, %v516_v30, %v518_v29  ;;  %v520_v33 = vsel %vm519_vm5, %v514_v13, %v516_v30 }
  0xa2   : > { %950 = vmatprep.subr.msk.bf16.mxu0 %vm282_vm0, %v521_v32  ;;  %v526_v37 = vsel %vm282_vm0, %v520_v33, 0 }
  0xa3   : > { %948 = vmatmul.mubr.msk.bf16.vlgmr.msra.gmra.mxu1 %vm278_vm1, %v946_v31 }
  0xa4   : > { %v579_v35 = vpop.permute.xlu1 %578  ;;  %v577_v36 = vpop.permute.xlu0 %576  ;;  %626 = vmatprep.mubr.bf16.mxu1 %v1092_v5 }
  0xa5   : > { %v583_v38 = vsel %vm582_vm6, %v577_v36, %v579_v35 }
  0xa6   : > { %945 = vmatmul.mubr.msk.bf16.vlgmr.msra.gmra.mxu0 %vm278_vm1, %v943_v34  ;;  %v589_v42 = vsel %vm282_vm0, %v583_v38, 0 }
  0xa7   : > { %546 = vmatpush1.bf16.msra.mxu0 %v526_v37  ;;  %563 = vmatprep.mubr.bf16.mxu0 %v1092_v5 }
  0xa8   : > { %v640_v39 = vpop.permute.xlu1 %639  ;;  %v581_v40 = vpop.permute.xlu0 %580 }
  0xa9   : > { %v584_v41 = vsel %vm582_vm6, %v579_v35, %v581_v40 }
  0xaa   : > { %953 = vmatprep.subr.msk.bf16.mxu1 %vm282_vm0, %v584_v41 }
  0xab   : > { %609 = vmatpush1.bf16.msra.mxu1 %v589_v42 }
  0xac   : > { %v644_v44 = vpop.permute.xlu1 %643  ;;  %v642_v45 = vpop.permute.xlu0 %641 }
  0xad   : > { %v646_v47 = vsel %vm645_vm7, %v640_v39, %v642_v45  ;;  %v647_v48 = vsel %vm645_vm7, %v642_v45, %v644_v44 }
  0xae   : > { %v652_v49 = vsel %vm282_vm0, %v646_v47, 0  ;;  %951 = vmatmul.mubr.msk.bf16.vlgmr.msra.gmra.mxu0 %vm278_vm1, %v949_v43  ;;  %956 = vmatprep.subr.msk.bf16.mxu0 %vm282_vm0, %v647_v48 }
  0xaf   : > { %672 = vmatpush1.bf16.msra.mxu0 %v652_v49  ;;  %954 = vmatmul.mubr.msk.bf16.vlgmr.msra.gmra.mxu1 %vm278_vm1, %v952_v46 }
  0xb0   : > { %v705_v50 = vpop.permute.xlu1 %704  ;;  %v703_v51 = vpop.permute.xlu0 %702  ;;  %689 = vmatprep.mubr.bf16.mxu0 %v1092_v5  ;;  %752 = vmatprep.mubr.bf16.mxu1 %v1092_v5 }
  0xb1   : > { %v709_v52 = vsel %vm708_vm8, %v703_v51, %v705_v50 }
  0xb2   : > { %v715_v57 = vsel %vm282_vm0, %v709_v52, 0 }
  0xb4   : > { %v766_v54 = vpop.permute.xlu1 %765  ;;  %v707_v55 = vpop.permute.xlu0 %706 }
  0xb5   : > { %v710_v56 = vsel %vm708_vm8, %v705_v50, %v707_v55 }
  0xb6   : > { %957 = vmatmul.mubr.msk.bf16.vlgmr.msra.gmra.mxu0 %vm278_vm1, %v955_v53  ;;  %959 = vmatprep.subr.msk.bf16.mxu1 %vm282_vm0, %v710_v56 }
  0xb7   : > { %735 = vmatpush1.bf16.msra.mxu1 %v715_v57  ;;  %815 = vmatprep.mubr.bf16.mxu0 %v1092_v5 }
  0xb8   : > { %v770_v59 = vpop.permute.xlu1 %769  ;;  %v768_v60 = vpop.permute.xlu0 %767 }
  0xb9   : > { %v772_v61 = vsel %vm771_vm9, %v766_v54, %v768_v60  ;;  %v773_v62 = vsel %vm771_vm9, %v768_v60, %v770_v59 }
  0xba   : > { %v778_v63 = vsel %vm282_vm0, %v772_v61, 0  ;;  %960 = vmatmul.mubr.msk.bf16.vlgmr.msra.gmra.mxu1 %vm278_vm1, %v958_v58  ;;  %962 = vmatprep.subr.msk.bf16.mxu0 %vm282_vm0, %v773_v62 }
  0xbb   : > { %798 = vmatpush1.bf16.msra.mxu0 %v778_v63 }
  0xbe   : > { %963 = vmatmul.mubr.msk.bf16.vlgmr.msra.gmra.mxu0 %vm278_vm1, %v961_v0 }
  0xc5   : > { %v830_v44 = vpop.permute.xlu0 %829 }
  0xdf   : > { %v378_v1 = vpop.f32.mrf.mxu1 }
  0xe1   : > { %v380_v2 = vpop.f32.mrf.mxu1 }
  0xe3   : > { %v382_v3 = vpop.f32.mrf.mxu1 }
  0xe5   : > { %v383_v4 = vpop.f32.mrf.mxu1 }
 0x15e   : > { %v323_v5 = vpop.f32.mrf.mxu0 }
 0x15f   : > { %v379_v17 = vadd.f32 %v378_v1, %v323_v5 }
 0x160   : > { %v325_v6 = vpop.f32.mrf.mxu0 }
 0x161   : > { %v381_v19 = vadd.f32 %v380_v2, %v325_v6 }
 0x162   : > { %v327_v7 = vpop.f32.mrf.mxu0 }
 0x163   : > { %v502_v8 = vpop.f32.mrf.mxu1 }
 0x164   : > { %v328_v9 = vpop.f32.mrf.mxu0 }
 0x165   : > { %v504_v10 = vpop.f32.mrf.mxu1 }
 0x166   : > { %v439_v11 = vpop.f32.mrf.mxu0 }
 0x167   : > { %v506_v12 = vpop.f32.mrf.mxu1  ;;  %v446_v20 = vadd.f32 %v439_v11, %v379_v17 }
 0x168   : > { %v441_v13 = vpop.f32.mrf.mxu0 }
 0x169   : > { %v507_v14 = vpop.f32.mrf.mxu1  ;;  %v447_v23 = vadd.f32 %v441_v13, %v381_v19  ;;  %v509_v26 = vadd.f32 %v502_v8, %v446_v20 }
 0x16a   : > { %v443_v15 = vpop.f32.mrf.mxu0 }
 0x16b   : > { %v510_v29 = vadd.f32 %v504_v10, %v447_v23 }
 0x16c   : > { %v444_v16 = vpop.f32.mrf.mxu0 }
 0x16e   : > { %v565_v18 = vpop.f32.mrf.mxu0 }
 0x16f   : > { %v628_v21 = vpop.f32.mrf.mxu1  ;;  %v572_v30 = vadd.f32 %v565_v18, %v509_v26 }
 0x170   : > { %v567_v22 = vpop.f32.mrf.mxu0 }
 0x171   : > { %v630_v24 = vpop.f32.mrf.mxu1  ;;  %v573_v33 = vadd.f32 %v567_v22, %v510_v29  ;;  %v635_v35 = vadd.f32 %v628_v21, %v572_v30 }
 0x172   : > { %v569_v25 = vpop.f32.mrf.mxu0 }
 0x173   : > { %v632_v27 = vpop.f32.mrf.mxu1  ;;  %v636_v38 = vadd.f32 %v630_v24, %v573_v33 }
 0x174   : > { %v570_v28 = vpop.f32.mrf.mxu0 }
 0x175   : > { %v633_v31 = vpop.f32.mrf.mxu1 }
 0x176   : > { %v691_v32 = vpop.f32.mrf.mxu0 }
 0x177   : > { %v698_v39 = vadd.f32 %v691_v32, %v635_v35 }
 0x178   : > { %v693_v34 = vpop.f32.mrf.mxu0 }
 0x179   : > { %v699_v42 = vadd.f32 %v693_v34, %v636_v38 }
 0x17a   : > { %v695_v36 = vpop.f32.mrf.mxu0  ;;  %v754_v37 = vpop.f32.mrf.mxu1 }
 0x17b   : > { %v761_v43 = vadd.f32 %v754_v37, %v698_v39 }
 0x17c   : > { %v696_v40 = vpop.f32.mrf.mxu0  ;;  %v756_v41 = vpop.f32.mrf.mxu1 }
 0x17d   : > { %v762_v47 = vadd.f32 %v756_v41, %v699_v42 }
 0x17e   : > { %v817_v45 = vpop.f32.mrf.mxu0  ;;  %v758_v46 = vpop.f32.mrf.mxu1 }
 0x17f   : > { %v824_v48 = vadd.f32 %v817_v45, %v761_v43 }
 0x180   : > { %v819_v49 = vpop.f32.mrf.mxu0  ;;  %v759_v50 = vpop.f32.mrf.mxu1 }
 0x181   : > { %v825_v51 = vadd.f32 %v819_v49, %v762_v47  ;;  %v832_v52 = vadd.f32 %v830_v44, %v824_v48 }
 0x182   : > { %v821_v53 = vpop.f32.mrf.mxu0 }
 0x183   : > { %v833_v54 = vadd.f32 %v830_v44, %v825_v51  ;;  %834 = vst [vmem:[%s226_s9] sm:$0xff] %v832_v52 }
 0x184   : > { %v822_v55 = vpop.f32.mrf.mxu0 }
 0x185   : > { %835 = vst [vmem:[%s226_s9 + $0x8] sm:$0xff] %v833_v54 }
 0x186   : > { %1041 = shalt.err (!%p1038_p4)
}
 0x187   : > { %s1042_s27 = scalar_lea.hbm %s1254_s13, 256  ;;  %s1046_s30 = scalar_lea.hbm %s1295_s4, 768 }
 0x188   : > { %p1043_p7 = scmp.ne.s32.totalorder %s1254_s13, %s1042_s27  ;;  %p1047_p10 = scmp.lt.s32.totalorder %s1254_s13, %s1295_s4 }
 0x189   : > { %p1048_p11 = scmp.lt.s32.totalorder %s1046_s30, %s1042_s27 }
 0x18a   : > { %p1044_p8 = pnand %p1043_p7, %p1163_p5 }
 0x18b   : > { %p1049_p12 = por %p1048_p11, %p1047_p10 }
 0x18c   : > { %p1045_p9 = pneg %p1044_p8 }
 0x18e   : > { %p1050_p13 = pnand %p1049_p12, %p1045_p9 }
 0x190   : > { %1053 = shalt.err (!%p1050_p13)
}
 0x191   : > { %976 = dma.vmem_to_hbm [thread:$0]  (%p1163_p5), %s852_s10, 256, %s1254_s13, %s837_s14  }
 0x192 PF: > { %p982_p0 = scmp.ge.s32.totalorder %s1088_s18, 2  ;;  %s863_s7 = sand.u32 1, %s1076_s15  }
 0x193   : > { %s864_s8 = scalar_lea.sflag [#allocation4], %s863_s7 }
 0x194   : > { %p979_p1 = pnand %p982_p0, %p1167_p6 }
 0x196   : > { %p980_p2 = pneg %p979_p1 }
 0x198   : > { %1071 = dma.done.wait (%p980_p2), %s864_s8, 256  }
 0x199   : > { %1073 = vsyncadd (%p980_p2), %s864_s8, 4294967040  ;;  %p14_p3 = scmp.ge.s32.totalorder %s1150_s21, 5   ;;  %s1298_s15 = smov %s1080_s16 }
 0x19a   : > { %s1299_s16 = smov %s1084_s17  ;;  %s1300_s17 = smov %s1161_s24 }
 0x19b   : > { %s1301_s18 = smov %s1150_s21  ;;  %16 = sbr.rel (!%p14_p3) target bundleno = 3 (0x3), region = 82 }
 0x1a0   :  { %869 = vsyncpa [#allocation4], 1 }
 0x1a1   :  { %871 = vsyncpa [#allocation4 + $0x1], 1 }

</bundles_post_ra>
